<compile_context>
chip_gen: v7x
topology: tpu7x:2x2x1
jax: 0.10.0
libtpu: 0.0.40
codegen_flags: <defaults>
</compile_context>

<pallas_src>
import functools

import jax
import jax.numpy as jnp
from jax.experimental import pallas as pl
from jax.experimental.pallas import tpu as pltpu


def _conv_kernel(x_ref, w_ref, b_ref, out_ref, *, shifts, q):
    """One grid step = one image.

    x_ref:   (1, Cin, Lp)      flattened zero-padded input (compute dtype)
    w_ref:   (KH*KW, Cout, Cin) reordered weights (compute dtype)
    b_ref:   (Cout, 1)          bias, f32
    out_ref: (1, Cout, Q)       "wide" output (f32), Q = rows * WP (lane-dense)
    """
    acc = None
    for idx, d in enumerate(shifts):          # static unrolled loop, KH*KW iters
        xs = x_ref[0, :, d:d + q]             # (Cin, Q) shifted window, VMEM slice
        part = jnp.dot(w_ref[idx], xs,        # (Cout, Cin) @ (Cin, Q) -> (Cout, Q)
                       preferred_element_type=jnp.float32)
        acc = part if acc is None else acc + part
    out_ref[0] = acc + b_ref[...]             # bias add in f32


def first_conv2d(x, weight, bias, stride, padding, *, compute_dtype=jnp.bfloat16):
    """Conv2d forward, NCHW in / NCHW out, matching nn.Conv2d semantics.

    Internally: flatten padded spatial onto the lane axis; conv = sum over
    (kh,kw) of (Cout,Cin) x (Cin, Q) matmuls on constant-shift windows of the
    flat input ("same-width" trick), computed per image inside the kernel.
    """
    N, Cin, H, W = x.shape
    Cout, Cin_w, KH, KW = weight.shape
    assert Cin == Cin_w
    s, p = int(stride), int(padding)
    OH = (H + 2 * p - KH) // s + 1
    OW = (W + 2 * p - KW) // s + 1

    WP = W + 2 * p
    HPe = H + 2 * p + 1          # +1 extra zero row so shifted flat windows never run OOB
    Lp = HPe * WP
    rows = (OH - 1) * s + 1      # wide output rows actually computed
    Q = rows * WP                # wide output width per image (lane axis of the kernel)

    # ---- glue (plain JAX, fused by XLA): pad + flatten + cast ----------------
    xp = jnp.pad(x, ((0, 0), (0, 0), (p, p + 1), (p, p)))
    x_flat = xp.reshape(N, Cin, Lp).astype(compute_dtype)
    # weight (Cout, Cin, KH, KW) -> (KH*KW, Cout, Cin), index kh*KW + kw
    w_r = jnp.transpose(weight, (2, 3, 0, 1)).reshape(KH * KW, Cout, Cin).astype(compute_dtype)
    b_r = bias.reshape(Cout, 1).astype(jnp.float32)

    # constant flat shift of each (kh, kw) tap within an image
    shifts = tuple(kh * WP + kw for kh in range(KH) for kw in range(KW))
    kernel = functools.partial(_conv_kernel, shifts=shifts, q=Q)

    bytes_accessed = (x_flat.size * x_flat.dtype.itemsize
                      + w_r.size * w_r.dtype.itemsize
                      + b_r.size * 4
                      + N * Cout * Q * 4)

    out_wide = pl.pallas_call(
        kernel,
        out_shape=jax.ShapeDtypeStruct((N, Cout, Q), jnp.float32),
        grid_spec=pltpu.PrefetchScalarGridSpec(
            num_scalar_prefetch=0,
            grid=(N,),
            in_specs=[
                pl.BlockSpec((1, Cin, Lp), lambda n: (n, 0, 0)),
                pl.BlockSpec((KH * KW, Cout, Cin), lambda n: (0, 0, 0)),
                pl.BlockSpec((Cout, 1), lambda n: (0, 0)),
            ],
            out_specs=pl.BlockSpec((1, Cout, Q), lambda n: (n, 0, 0)),
        ),
        compiler_params=pltpu.CompilerParams(
            dimension_semantics=("parallel",),      # batch axis -> v7x megacore
            # above v5e's 16 MiB default, below v7x's 64 MiB physical VMEM
            vmem_limit_bytes=48 * 1024 * 1024,
        ),
        cost_estimate=pl.CostEstimate(
            flops=2 * N * Q * Cin * KH * KW * Cout,
            transcendentals=0,
            bytes_accessed=int(bytes_accessed),
        ),
    )(x_flat, w_r, b_r)

    # ---- reconstruct NCHW: drop wide rows/cols (and stride them) -------------
    out = out_wide.reshape(N, Cout, rows, WP)[:, :, ::s, ::s][:, :, :, :OW]
    return out


if __name__ == "__main__":
    # Module config (synthetic, deterministic init — no checkpoint load)
    inplanes, planes = 4, 8
    kernel_size, stride, padding = 3, 1, 1
    N, H, W = 2, 16, 16

    key = jax.random.PRNGKey(0)
    kx, kw, kb = jax.random.split(key, 3)
    x = jax.random.normal(kx, (N, inplanes, H, W), dtype=jnp.float32)
    fan_in = inplanes * kernel_size * kernel_size
    bound = 1.0 / (fan_in ** 0.5)
    weight = jax.random.uniform(kw, (planes, inplanes, kernel_size, kernel_size),
                                minval=-bound, maxval=bound, dtype=jnp.float32)
    bias = jax.random.uniform(kb, (planes,), minval=-bound, maxval=bound,
                              dtype=jnp.float32)

    out = first_conv2d(x, weight, bias, stride, padding)
    out = jax.block_until_ready(out)

    # Reference: XLA conv in full f32 precision (silent on success).
    ref = jax.lax.conv_general_dilated(
        x, weight, window_strides=(stride, stride),
        padding=[(padding, padding), (padding, padding)],
        dimension_numbers=("NCHW", "OIHW", "NCHW"),
        precision=jax.lax.Precision.HIGHEST,
    ) + bias.reshape(1, planes, 1, 1)

    assert out.shape == ref.shape == (N, planes, H, W)
    # bf16 operands (f32 accumulation) inside the kernel -> tolerance ~1e-2.
    err = float(jnp.max(jnp.abs(out - ref)))
    assert jnp.allclose(out, ref, atol=2e-2, rtol=2e-2), err

    print("KERNEL_OK")
</pallas_src>

<mosaic_0001>
module attributes {stable_mosaic.version = 11 : i64} {
  func.func @_conv_kernel(%arg0: i32, %arg1: memref<1x4x342xbf16, #tpu.memory_space<vmem>>, %arg2: memref<9x8x4xbf16, #tpu.memory_space<vmem>>, %arg3: memref<8x1xf32, #tpu.memory_space<vmem>>, %arg4: memref<1x8x288xf32, #tpu.memory_space<vmem>>) attributes {dimension_semantics = [#tpu.dimension_semantics<parallel>], iteration_bounds = array<i64: 2>, scalar_prefetch = 0 : i64, scratch_operands = 0 : i64, tpu.core_type = #tpu.core_type<tc>, window_params = [{transform_indices = @transform_0, window_bounds = array<i64: 1, 4, 342>}, {pipeline_mode = #tpu.pipeline_mode<synchronous>, transform_indices = @transform_1, window_bounds = array<i64: 9, 8, 4>}, {pipeline_mode = #tpu.pipeline_mode<synchronous>, transform_indices = @transform_2, window_bounds = array<i64: 8, 1>}, {transform_indices = @transform_3, window_bounds = array<i64: 1, 8, 288>}]} {
    %c0 = arith.constant 0 : index
    %c0_0 = arith.constant 0 : index
    %c0_1 = arith.constant 0 : index
    %0 = vector.load %arg1[%c0, %c0_0, %c0_1] : memref<1x4x342xbf16, #tpu.memory_space<vmem>>, vector<1x4x288xbf16>
    %1 = vector.shape_cast %0 : vector<1x4x288xbf16> to vector<4x288xbf16>
    %c0_2 = arith.constant 0 : index
    %c0_3 = arith.constant 0 : index
    %c0_4 = arith.constant 0 : index
    %2 = vector.load %arg2[%c0_2, %c0_3, %c0_4] : memref<9x8x4xbf16, #tpu.memory_space<vmem>>, vector<1x8x4xbf16>
    %3 = vector.shape_cast %2 : vector<1x8x4xbf16> to vector<8x4xbf16>
    %cst = arith.constant dense<0.000000e+00> : vector<8x288xf32>
    %4 = tpu.matmul %3, %1, %cst {dimension_numbers = #tpu.dot_dimension_numbers<[1], [0], [0], [1], [0, 0, 1, 1], [], []>} : vector<8x4xbf16>, vector<4x288xbf16>, vector<8x288xf32> -> vector<8x288xf32>
    %c0_5 = arith.constant 0 : index
    %c0_6 = arith.constant 0 : index
    %c1 = arith.constant 1 : index
    %5 = vector.load %arg1[%c0_5, %c0_6, %c1] : memref<1x4x342xbf16, #tpu.memory_space<vmem>>, vector<1x4x288xbf16>
    %6 = vector.shape_cast %5 : vector<1x4x288xbf16> to vector<4x288xbf16>
    %c1_7 = arith.constant 1 : index
    %c0_8 = arith.constant 0 : index
    %c0_9 = arith.constant 0 : index
    %7 = vector.load %arg2[%c1_7, %c0_8, %c0_9] : memref<9x8x4xbf16, #tpu.memory_space<vmem>>, vector<1x8x4xbf16>
    %8 = vector.shape_cast %7 : vector<1x8x4xbf16> to vector<8x4xbf16>
    %cst_10 = arith.constant dense<0.000000e+00> : vector<8x288xf32>
    %9 = tpu.matmul %8, %6, %cst_10 {dimension_numbers = #tpu.dot_dimension_numbers<[1], [0], [0], [1], [0, 0, 1, 1], [], []>} : vector<8x4xbf16>, vector<4x288xbf16>, vector<8x288xf32> -> vector<8x288xf32>
    %10 = arith.addf %4, %9 : vector<8x288xf32>
    %c0_11 = arith.constant 0 : index
    %c0_12 = arith.constant 0 : index
    %c2 = arith.constant 2 : index
    %11 = vector.load %arg1[%c0_11, %c0_12, %c2] : memref<1x4x342xbf16, #tpu.memory_space<vmem>>, vector<1x4x288xbf16>
    %12 = vector.shape_cast %11 : vector<1x4x288xbf16> to vector<4x288xbf16>
    %c2_13 = arith.constant 2 : index
    %c0_14 = arith.constant 0 : index
    %c0_15 = arith.constant 0 : index
    %13 = vector.load %arg2[%c2_13, %c0_14, %c0_15] : memref<9x8x4xbf16, #tpu.memory_space<vmem>>, vector<1x8x4xbf16>
    %14 = vector.shape_cast %13 : vector<1x8x4xbf16> to vector<8x4xbf16>
    %cst_16 = arith.constant dense<0.000000e+00> : vector<8x288xf32>
    %15 = tpu.matmul %14, %12, %cst_16 {dimension_numbers = #tpu.dot_dimension_numbers<[1], [0], [0], [1], [0, 0, 1, 1], [], []>} : vector<8x4xbf16>, vector<4x288xbf16>, vector<8x288xf32> -> vector<8x288xf32>
    %16 = arith.addf %10, %15 : vector<8x288xf32>
    %c0_17 = arith.constant 0 : index
    %c0_18 = arith.constant 0 : index
    %c18 = arith.constant 18 : index
    %17 = vector.load %arg1[%c0_17, %c0_18, %c18] : memref<1x4x342xbf16, #tpu.memory_space<vmem>>, vector<1x4x288xbf16>
    %18 = vector.shape_cast %17 : vector<1x4x288xbf16> to vector<4x288xbf16>
    %c3 = arith.constant 3 : index
    %c0_19 = arith.constant 0 : index
    %c0_20 = arith.constant 0 : index
    %19 = vector.load %arg2[%c3, %c0_19, %c0_20] : memref<9x8x4xbf16, #tpu.memory_space<vmem>>, vector<1x8x4xbf16>
    %20 = vector.shape_cast %19 : vector<1x8x4xbf16> to vector<8x4xbf16>
    %cst_21 = arith.constant dense<0.000000e+00> : vector<8x288xf32>
    %21 = tpu.matmul %20, %18, %cst_21 {dimension_numbers = #tpu.dot_dimension_numbers<[1], [0], [0], [1], [0, 0, 1, 1], [], []>} : vector<8x4xbf16>, vector<4x288xbf16>, vector<8x288xf32> -> vector<8x288xf32>
    %22 = arith.addf %16, %21 : vector<8x288xf32>
    %c0_22 = arith.constant 0 : index
    %c0_23 = arith.constant 0 : index
    %c19 = arith.constant 19 : index
    %23 = vector.load %arg1[%c0_22, %c0_23, %c19] : memref<1x4x342xbf16, #tpu.memory_space<vmem>>, vector<1x4x288xbf16>
    %24 = vector.shape_cast %23 : vector<1x4x288xbf16> to vector<4x288xbf16>
    %c4 = arith.constant 4 : index
    %c0_24 = arith.constant 0 : index
    %c0_25 = arith.constant 0 : index
    %25 = vector.load %arg2[%c4, %c0_24, %c0_25] : memref<9x8x4xbf16, #tpu.memory_space<vmem>>, vector<1x8x4xbf16>
    %26 = vector.shape_cast %25 : vector<1x8x4xbf16> to vector<8x4xbf16>
    %cst_26 = arith.constant dense<0.000000e+00> : vector<8x288xf32>
    %27 = tpu.matmul %26, %24, %cst_26 {dimension_numbers = #tpu.dot_dimension_numbers<[1], [0], [0], [1], [0, 0, 1, 1], [], []>} : vector<8x4xbf16>, vector<4x288xbf16>, vector<8x288xf32> -> vector<8x288xf32>
    %28 = arith.addf %22, %27 : vector<8x288xf32>
    %c0_27 = arith.constant 0 : index
    %c0_28 = arith.constant 0 : index
    %c20 = arith.constant 20 : index
    %29 = vector.load %arg1[%c0_27, %c0_28, %c20] : memref<1x4x342xbf16, #tpu.memory_space<vmem>>, vector<1x4x288xbf16>
    %30 = vector.shape_cast %29 : vector<1x4x288xbf16> to vector<4x288xbf16>
    %c5 = arith.constant 5 : index
    %c0_29 = arith.constant 0 : index
    %c0_30 = arith.constant 0 : index
    %31 = vector.load %arg2[%c5, %c0_29, %c0_30] : memref<9x8x4xbf16, #tpu.memory_space<vmem>>, vector<1x8x4xbf16>
    %32 = vector.shape_cast %31 : vector<1x8x4xbf16> to vector<8x4xbf16>
    %cst_31 = arith.constant dense<0.000000e+00> : vector<8x288xf32>
    %33 = tpu.matmul %32, %30, %cst_31 {dimension_numbers = #tpu.dot_dimension_numbers<[1], [0], [0], [1], [0, 0, 1, 1], [], []>} : vector<8x4xbf16>, vector<4x288xbf16>, vector<8x288xf32> -> vector<8x288xf32>
    %34 = arith.addf %28, %33 : vector<8x288xf32>
    %c0_32 = arith.constant 0 : index
    %c0_33 = arith.constant 0 : index
    %c36 = arith.constant 36 : index
    %35 = vector.load %arg1[%c0_32, %c0_33, %c36] : memref<1x4x342xbf16, #tpu.memory_space<vmem>>, vector<1x4x288xbf16>
    %36 = vector.shape_cast %35 : vector<1x4x288xbf16> to vector<4x288xbf16>
    %c6 = arith.constant 6 : index
    %c0_34 = arith.constant 0 : index
    %c0_35 = arith.constant 0 : index
    %37 = vector.load %arg2[%c6, %c0_34, %c0_35] : memref<9x8x4xbf16, #tpu.memory_space<vmem>>, vector<1x8x4xbf16>
    %38 = vector.shape_cast %37 : vector<1x8x4xbf16> to vector<8x4xbf16>
    %cst_36 = arith.constant dense<0.000000e+00> : vector<8x288xf32>
    %39 = tpu.matmul %38, %36, %cst_36 {dimension_numbers = #tpu.dot_dimension_numbers<[1], [0], [0], [1], [0, 0, 1, 1], [], []>} : vector<8x4xbf16>, vector<4x288xbf16>, vector<8x288xf32> -> vector<8x288xf32>
    %40 = arith.addf %34, %39 : vector<8x288xf32>
    %c0_37 = arith.constant 0 : index
    %c0_38 = arith.constant 0 : index
    %c37 = arith.constant 37 : index
    %41 = vector.load %arg1[%c0_37, %c0_38, %c37] : memref<1x4x342xbf16, #tpu.memory_space<vmem>>, vector<1x4x288xbf16>
    %42 = vector.shape_cast %41 : vector<1x4x288xbf16> to vector<4x288xbf16>
    %c7 = arith.constant 7 : index
    %c0_39 = arith.constant 0 : index
    %c0_40 = arith.constant 0 : index
    %43 = vector.load %arg2[%c7, %c0_39, %c0_40] : memref<9x8x4xbf16, #tpu.memory_space<vmem>>, vector<1x8x4xbf16>
    %44 = vector.shape_cast %43 : vector<1x8x4xbf16> to vector<8x4xbf16>
    %cst_41 = arith.constant dense<0.000000e+00> : vector<8x288xf32>
    %45 = tpu.matmul %44, %42, %cst_41 {dimension_numbers = #tpu.dot_dimension_numbers<[1], [0], [0], [1], [0, 0, 1, 1], [], []>} : vector<8x4xbf16>, vector<4x288xbf16>, vector<8x288xf32> -> vector<8x288xf32>
    %46 = arith.addf %40, %45 : vector<8x288xf32>
    %c0_42 = arith.constant 0 : index
    %c0_43 = arith.constant 0 : index
    %c38 = arith.constant 38 : index
    %47 = vector.load %arg1[%c0_42, %c0_43, %c38] : memref<1x4x342xbf16, #tpu.memory_space<vmem>>, vector<1x4x288xbf16>
    %48 = vector.shape_cast %47 : vector<1x4x288xbf16> to vector<4x288xbf16>
    %c8 = arith.constant 8 : index
    %c0_44 = arith.constant 0 : index
    %c0_45 = arith.constant 0 : index
    %49 = vector.load %arg2[%c8, %c0_44, %c0_45] : memref<9x8x4xbf16, #tpu.memory_space<vmem>>, vector<1x8x4xbf16>
    %50 = vector.shape_cast %49 : vector<1x8x4xbf16> to vector<8x4xbf16>
    %cst_46 = arith.constant dense<0.000000e+00> : vector<8x288xf32>
    %51 = tpu.matmul %50, %48, %cst_46 {dimension_numbers = #tpu.dot_dimension_numbers<[1], [0], [0], [1], [0, 0, 1, 1], [], []>} : vector<8x4xbf16>, vector<4x288xbf16>, vector<8x288xf32> -> vector<8x288xf32>
    %52 = arith.addf %46, %51 : vector<8x288xf32>
    %c0_47 = arith.constant 0 : index
    %c0_48 = arith.constant 0 : index
    %53 = vector.load %arg3[%c0_47, %c0_48] : memref<8x1xf32, #tpu.memory_space<vmem>>, vector<8x1xf32>
    %54 = vector.broadcast %53 : vector<8x1xf32> to vector<8x288xf32>
    %55 = arith.addf %52, %54 : vector<8x288xf32>
    %c0_49 = arith.constant 0 : index
    %c0_50 = arith.constant 0 : index
    %c0_51 = arith.constant 0 : index
    %56 = vector.load %arg4[%c0_49, %c0_50, %c0_51] : memref<1x8x288xf32, #tpu.memory_space<vmem>>, vector<1x8x288xf32>
    %57 = vector.shape_cast %56 : vector<1x8x288xf32> to vector<8x288xf32>
    %58 = vector.shape_cast %55 : vector<8x288xf32> to vector<1x8x288xf32>
    tpu.vector_store %arg4[%c0_49, %c0_50, %c0_51], %58 {strides = array<i32>} : memref<1x8x288xf32, #tpu.memory_space<vmem>>, vector<1x8x288xf32>,
    return
  }
  func.func @transform_0(%arg0: i32) -> (i32, i32, i32) {
    %c0_i32 = arith.constant 0 : i32
    %c0_i32_0 = arith.constant 0 : i32
    %c0_i32_1 = arith.constant 0 : i32
    return %arg0, %c0_i32, %c0_i32_0 : i32, i32, i32
  }
  func.func @transform_1(%arg0: i32) -> (i32, i32, i32) {
    %c0_i32 = arith.constant 0 : i32
    %c0_i32_0 = arith.constant 0 : i32
    %c0_i32_1 = arith.constant 0 : i32
    %c0_i32_2 = arith.constant 0 : i32
    return %c0_i32, %c0_i32_0, %c0_i32_1 : i32, i32, i32
  }
  func.func @transform_2(%arg0: i32) -> (i32, i32) {
    %c0_i32 = arith.constant 0 : i32
    %c0_i32_0 = arith.constant 0 : i32
    %c0_i32_1 = arith.constant 0 : i32
    return %c0_i32, %c0_i32_0 : i32, i32
  }
  func.func @transform_3(%arg0: i32) -> (i32, i32, i32) {
    %c0_i32 = arith.constant 0 : i32
    %c0_i32_0 = arith.constant 0 : i32
    %c0_i32_1 = arith.constant 0 : i32
    return %arg0, %c0_i32, %c0_i32_0 : i32, i32, i32
  }
}

</mosaic_0001>

<bundles_post_ra>
// kernel: tpu_custom_call.1
= control target key start
LH: loop header
LB: loop body
LE: loop exit
PB: predicated region body
PF: predicated region fallthrough
CT: control target
= control target key end

     0   :  { %8 = vsyncpa [#allocation3], 0  ;;  %s1885_s0 = inlined_call_operand.vmem [shape: bf16[2,4,342], index: 0, kind: input, shape index: {}]   ;;  %s1886_s1 = inlined_call_operand.vmem [shape: bf16[9,8,4], index: 1, kind: input, shape index: {}]   ;;  %s1887_s2 = inlined_call_operand.vmem [shape: f32[8,1], index: 2, kind: input, shape index: {}]   ;;  %s1888_s3 = inlined_call_operand.hbm [shape: f32[2,8,288], index: 3, kind: output, shape index: {}]  }
   0x1   :  { %10 = vsyncpa [#allocation3 + $0x1], 0  ;;  %s1625_s12 = smov 0   ;;  %s1627_s13 = smov 0  }
   0x2   :  { %s1629_s14 = smov 0   ;;  %s1631_s15 = smov 0  }
   0x3 LB: > { %s1646_s16 = sadd.s32 4294967295, %s1590_s15   ;;  %s1350_s17 = sadd.s32 4294967294, %s1590_s15   ;;  %s1590_s15 = sphi %s1631_s15, %s1894_s15   ;;  %s1586_s14 = sphi %s1629_s14, %s1893_s14   ;;  %s1582_s13 = sphi %s1627_s13, %s1892_s13   ;;  %s1578_s12 = sphi %s1625_s12, %s1891_s12  }
   0x4   : > { %s1650_s18 = sadd.s32 1, %s1590_s15   ;;  %s91_s19 = sadd.s32 1, %s1586_s14 }
   0x5   : > { %s88_s20 = ssub.s32 %s1590_s15, %s1650_s18  ;;  %p101_p0 = scmp.ne.s32.totalorder %s1586_s14, %s1582_s13 }
   0x6   : > { %p89_p1 = scmp.eq.s32.totalorder %s88_s20, 0  ;;  %p102_p2 = scmp.eq.s32.totalorder %s1646_s16, 1 }
   0x7   : > { %p107_p3 = scmp.ne.s32.totalorder %s1582_s13, %s1578_s12  ;;  %p108_p4 = scmp.eq.s32.totalorder %s1350_s17, 1 }
   0x8   : > { %s1661_s21 = scalar_select %p89_p1, %s1586_s14, %s91_s19  }
   0x9   : > { %p1663_p5 = por %p102_p2, %p101_p0  ;;  %p1667_p6 = por %p108_p4, %p107_p3 }
   0xa   : > { %p1353_p7 = scmp.ge.s32.totalorder %s1590_s15, 1  ;;  %p140_p8 = scmp.lt.s32.totalorder %s1590_s15, 3 }
   0xc   : > { %p141_p9 = pnand %p1353_p7, %p140_p8 }
   0xd   : > { %p164_p10 = scmp.lt.s32.totalorder (!%p141_p9), %s1646_s16, 1  ;;  %v179_v0 = vlaneseq (!%p141_p9)  ;;  %v1592_v1 = vmov (!%p141_p9), 1983009808   ;;  %v1593_v3 = vmov (!%p141_p9), 0.0   ;;  %vm1594_vm0 = vmmov (!%p141_p9), 0   ;;  %s1596_s29 = smov (!%p141_p9), 127  }
   0xe   : > { %144 = sbr.rel (%p141_p9) target bundleno = 448 (0x1c0), region = 32  ;;  %v177_v2 = vunpack.c.l.s4 (!%p141_p9), %v1592_v1  ;;  %1411 = vmatprep.subr.bf16.mxu1 (!%p141_p9), %v1593_v3  ;;  %1413 = vmatprep.mubr.msk.bf16.mxu1 (!%p141_p9), %vm1594_vm0, %v1593_v3  ;;  %v1595_v6 = vmov (!%p141_p9), 0   ;;  %s1597_s30 = smov (!%p141_p9), 126   ;;  %v1263_v48 = vld [vmem:[%s1887_s2] sm:$0xff] (!%p141_p9)  ;;  %vm204_vm1 = vcmask (!%p141_p9), 1041408   ;;  %vm197_vm2 = vcmask (!%p141_p9), 1039360  }
   0xf   : > { %v180_v4 = vshrl.u32 (!%p141_p9), %v179_v0, 7  ;;  %246 = vmatprep.mubr.bf16.mxu0 (!%p141_p9), %v1595_v6  ;;  %1519 = vset.pattern.permute.xlu0 (!%p141_p9), %v1595_v6  ;;  %s1598_s4 = smov (!%p141_p9), 110   ;;  %s1599_s5 = smov (!%p141_p9), 109   ;;  %v1355_v53 = vld [vmem:[%s1886_s1 + $0x4] sm:$0xf] (!%p141_p9)  ;;  %vm200_vm3 = vcmask (!%p141_p9), 31744  }
  0x10   : > { %v178_v5 = vunpack.c.0.s8 (!%p141_p9), %v177_v2  ;;  %s1600_s6 = smov (!%p141_p9), 108   ;;  %s1601_s7 = smov (!%p141_p9), 92   ;;  %vm414_vm4 = vcmask (!%p141_p9), 1031168   ;;  %v171_v63 = vld [vmem:[%s1886_s1] sm:$0xf] (!%p141_p9)  ;;  %vm539_vm5 = vcmask (!%p141_p9), 900096  }
  0x11   : > { %s1602_s8 = smov (!%p141_p9), 91   ;;  %s1603_s9 = smov (!%p141_p9), 90   ;;  %vm664_vm6 = vcmask (!%p141_p9), 891904   ;;  %vm789_vm7 = vcmask (!%p141_p9), 883712   ;;  %vm914_vm8 = vcmask (!%p141_p9), 752640   ;;  %vm1039_vm9 = vcmask (!%p141_p9), 744448  }
  0x12   : > { %v1680_v7 = vsub.s32 (!%p141_p9), %v178_v5, %v180_v4  ;;  %vm1164_vm10 = vcmask (!%p141_p9), 736256   ;;  %s161_s17 = sand.u32 (!%p141_p9), 1, %s1582_s13   ;;  %vm1274_vm11 = vcmask (!%p141_p9), 261120   ;;  %s1467_s20 = smul.u32 (!%p141_p9), 384, %s1646_s16 }
  0x13   : > { %s1465_s19 = smul.u32 (!%p141_p9), 24, %s161_s17 }
  0x15   : > { %s165_s24 = scalar_select %p164_p10, %s1646_s16, 1 }
  0x16   : > { %s1277_s16 = scalar_lea.sflag [#allocation3], %s161_s17 }
  0x17   : > { %s1466_s25 = smul.u32 6, %s165_s24  ;;  %s163_s24 = scalar_lea.vmem [#allocation2], %s1465_s19 }
  0x19   : > { %s1685_s28 = scalar_lea.vmem %s1885_s0, %s1466_s25  ;;  %s1291_s25 = sshll.u32 %s163_s24, 4  ;;  %s1843_s25 = int_to_ptr.vmem [resolvable:$true] %s1291_s25 }
  0x1a   : > { %v170_v8 = vld [vmem:[%s1685_s28] sm:$0x3f] }
  0x1b   : > { %v1689_v9 = vrot.slane %v170_v8, %v1680_v7  ;;  %v175_v10 = vcombine.high %v170_v8, %v170_v8  ;;  %v388_v11 = vld [vmem:[%s1685_s28] sm:$0x3f] }
  0x1c   : > { %v399_v14 = vrot.slane %v388_v11, %v1680_v7  ;;  %v392_v15 = vcombine.high %v388_v11, %v388_v11  ;;  %v513_v17 = vld [vmem:[%s1685_s28] sm:$0x3f] }
  0x1d   : > { %191 = vrot.lane.b32.xlu0 %v1689_v9, %s1596_s29  ;;  %v1694_v12 = vrot.slane %v175_v10, %v1680_v7  ;;  %v1698_v13 = vcombine.high %v1689_v9, %v1689_v9  ;;  %v524_v19 = vrot.slane %v513_v17, %v1680_v7  ;;  %v517_v20 = vcombine.high %v513_v17, %v513_v17  ;;  %v638_v22 = vld [vmem:[%s1685_s28] sm:$0x3f]  ;;  %v1362_v10 = vld [vmem:[%s1886_s1 + $0x8] sm:$0xf] }
  0x1e   : > { %v407_v16 = vcombine.high %v399_v14, %v399_v14  ;;  %v406_v18 = vrot.slane %v392_v15, %v1680_v7  ;;  %v649_v24 = vrot.slane %v638_v22, %v1680_v7  ;;  %v642_v25 = vcombine.high %v638_v22, %v638_v22  ;;  %v763_v27 = vld [vmem:[%s1685_s28] sm:$0x3f] }
  0x1f   : > { %195 = vrot.lane.b32.xlu1 %v1694_v12, %s1596_s29  ;;  %v532_v21 = vcombine.high %v524_v19, %v524_v19  ;;  %v531_v23 = vrot.slane %v517_v20, %v1680_v7  ;;  %v774_v29 = vrot.slane %v763_v27, %v1680_v7  ;;  %v767_v30 = vcombine.high %v763_v27, %v763_v27  ;;  %v888_v32 = vld [vmem:[%s1685_s28] sm:$0x3f]  ;;  %v1370_v27 = vld [vmem:[%s1886_s1 + $0x10] sm:$0xf] }
  0x20   : > { %v657_v26 = vcombine.high %v649_v24, %v649_v24  ;;  %v656_v28 = vrot.slane %v642_v25, %v1680_v7  ;;  %v899_v34 = vrot.slane %v888_v32, %v1680_v7  ;;  %v892_v35 = vcombine.high %v888_v32, %v888_v32  ;;  %v1013_v37 = vld [vmem:[%s1685_s28] sm:$0x3f] }
  0x21   : > { %193 = vrot.lane.b32.xlu0 %v1698_v13, %s1596_s29  ;;  %v782_v31 = vcombine.high %v774_v29, %v774_v29  ;;  %v781_v33 = vrot.slane %v767_v30, %v1680_v7  ;;  %v1024_v39 = vrot.slane %v1013_v37, %v1680_v7  ;;  %v1017_v40 = vcombine.high %v1013_v37, %v1013_v37  ;;  %v1138_v42 = vld [vmem:[%s1685_s28] sm:$0x3f]  ;;  %s1841_s28 = scalar_lea.hbm %s1888_s3, %s1467_s20  ;;  %s1528_s29 = scalar_lea.vmem %s1843_s25, 384 }
  0x22   : > { %v907_v36 = vcombine.high %v899_v34, %v899_v34  ;;  %v906_v38 = vrot.slane %v892_v35, %v1680_v7  ;;  %v1149_v44 = vrot.slane %v1138_v42, %v1680_v7  ;;  %v1142_v45 = vcombine.high %v1138_v42, %v1138_v42  ;;  %v1374_v35 = vld [vmem:[%s1886_s1 + $0x14] sm:$0xf]  ;;  %v1378_v42 = vld [vmem:[%s1886_s1 + $0x18] sm:$0xf]  ;;  %p1529_p11 = scmp.ne.s32.totalorder %s1843_s25, %s1528_s29 }
  0x23   : > { %408 = vrot.lane.b32.xlu1 %v399_v14, %s1597_s30  ;;  %v1032_v41 = vcombine.high %v1024_v39, %v1024_v39  ;;  %v1031_v43 = vrot.slane %v1017_v40, %v1680_v7  ;;  %v305_v56 = vsel %vm204_vm1, %v1694_v12, 0  ;;  %v299_v59 = vsel %vm204_vm1, %v1689_v9, 0 }
  0x24   : > { %v1157_v46 = vcombine.high %v1149_v44, %v1149_v44  ;;  %v1156_v47 = vrot.slane %v1142_v45, %v1680_v7  ;;  %p1530_p12 = pnand %p1529_p11, %p1663_p5 }
  0x25   : > { %410 = vrot.lane.b32.xlu0 %v407_v16, %s1597_s30 }
  0x26   : > { %p1531_p13 = pneg %p1530_p12 }
  0x27   : > { %412 = vrot.lane.b32.xlu1 %v406_v18, %s1597_s30  ;;  %s1604_s30 = smov [#allocation2]  }
  0x29   : > { %533 = vrot.lane.b32.xlu0 %v524_v19, %s1598_s4  ;;  %v1366_v19 = vld [vmem:[%s1886_s1 + $0xc] sm:$0xf] }
  0x2b   : > { %535 = vrot.lane.b32.xlu1 %v532_v21, %s1598_s4 }
  0x2d   : > { %537 = vrot.lane.b32.xlu0 %v531_v23, %s1598_s4  ;;  %s1532_s4 = sshll.u32 %s1604_s30, 4  ;;  %s1533_s4 = int_to_ptr.vmem [resolvable:$false] %s1532_s4 }
  0x2e   : > { %p1535_p0 = scmp.lt.s32.totalorder %s1843_s25, %s1533_s4 }
  0x2f   : > { %658 = vrot.lane.b32.xlu1 %v649_v24, %s1599_s5 }
  0x31   : > { %660 = vrot.lane.b32.xlu0 %v657_v26, %s1599_s5 }
  0x33   : > { %662 = vrot.lane.b32.xlu1 %v656_v28, %s1599_s5  ;;  %s1534_s5 = scalar_lea.vmem %s1533_s4, 768 }
  0x34   : > { %p1536_p1 = scmp.lt.s32.totalorder %s1534_s5, %s1528_s29 }
  0x35   : > { %783 = vrot.lane.b32.xlu0 %v774_v29, %s1600_s6 }
  0x36   : > { %p1537_p2 = por %p1536_p1, %p1535_p0 }
  0x37   : > { %785 = vrot.lane.b32.xlu1 %v782_v31, %s1600_s6 }
  0x38   : > { %p1538_p3 = pnand %p1537_p2, %p1531_p13 }
  0x39   : > { %787 = vrot.lane.b32.xlu0 %v781_v33, %s1600_s6 }
  0x3b   : > { %908 = vrot.lane.b32.xlu1 %v899_v34, %s1601_s7 }
  0x3d   : > { %910 = vrot.lane.b32.xlu0 %v907_v36, %s1601_s7 }
  0x3f   : > { %912 = vrot.lane.b32.xlu1 %v906_v38, %s1601_s7 }
  0x41   : > { %1033 = vrot.lane.b32.xlu0 %v1024_v39, %s1602_s8 }
  0x43   : > { %1035 = vrot.lane.b32.xlu1 %v1032_v41, %s1602_s8 }
  0x45   : > { %1037 = vrot.lane.b32.xlu0 %v1031_v43, %s1602_s8 }
  0x47   : > { %1158 = vrot.lane.b32.xlu1 %v1149_v44, %s1603_s9 }
  0x49   : > { %1160 = vrot.lane.b32.xlu0 %v1157_v46, %s1603_s9 }
  0x4b   : > { %1162 = vrot.lane.b32.xlu1 %v1156_v47, %s1603_s9 }
  0x4d   : > { %1266 = vperm.xlu0 %1519, %v1263_v48  }
  0x8f   : > { %v192_v49 = vpop.permute.xlu0 %191 }
  0x91   : > { %v196_v50 = vpop.permute.xlu1 %195 }
  0x92   : > { %v212_v51 = vsel %vm204_vm1, %v196_v50, 0 }
  0x93   : > { %v194_v52 = vpop.permute.xlu0 %193  ;;  %1412 = vmatpush3.bf16.msra.mxu1 %v212_v51 }
  0x94   : > { %v199_v54 = vsel %vm197_vm2, %v194_v52, %v196_v50  ;;  %v198_v55 = vsel %vm197_vm2, %v192_v49, %v194_v52  ;;  %1417 = vmatprep.subr.bf16.mxu1 %v1593_v3  ;;  %v1382_v49 = vld [vmem:[%s1886_s1 + $0x1c] sm:$0xf] }
  0x95   : > { %1356 = vmatprep.subr.msk.bf16.mxu0 %vm204_vm1, %v199_v54  ;;  %v206_v57 = vsel %vm204_vm1, %v198_v55, 0  ;;  %v409_v58 = vpop.permute.xlu1 %408 }
  0x96   : > { %215 = vmatpush1.bf16.msra.mxu0 %v206_v57  ;;  %1414 = vmatmul.mubr.msk.bf16.vlgmr.msra.gmra.mrb[0].mxu1 %vm200_vm3, %v1355_v53 }
  0x97   : > { %1359 = vmatprep.subr.msk.bf16.mxu0 %vm204_vm1, %v1698_v13  ;;  %v411_v60 = vpop.permute.xlu0 %410  ;;  %1418 = vmatpush3.bf16.msra.mxu1 %v305_v56 }
  0x98   : > { %1419 = vmatprep.mubr.msk.bf16.mxu1 %vm1594_vm0, %v1593_v3  ;;  %1423 = vmatprep.subr.bf16.mxu1 %v1593_v3  ;;  %v415_v1 = vsel %vm414_vm4, %v409_v58, %v411_v60 }
  0x99   : > { %1357 = vmatmul.mubr.msk.bf16.vlgmr.msra.gmra.mrb[0].mxu0 %vm200_vm3, %v1355_v53  ;;  %v413_v61 = vpop.permute.xlu1 %412  ;;  %v421_v5 = vsel %vm204_vm1, %v415_v1, 0  ;;  %v1386_v53 = vld [vmem:[%s1886_s1 + $0x20] sm:$0xf] }
  0x9a   : > { %308 = vmatpush1.bf16.msra.mxu0 %v299_v59  ;;  %v416_v62 = vsel %vm414_vm4, %v411_v60, %v413_v61  ;;  %339 = vmatprep.mubr.bf16.mxu0 %v1595_v6  ;;  %v427_v2 = vsel %vm204_vm1, %v413_v61, 0 }
  0x9b   : > { %1363 = vmatprep.subr.msk.bf16.mxu0 %vm204_vm1, %v416_v62  ;;  %v534_v0 = vpop.permute.xlu0 %533 }
  0x9d   : > { %v536_v4 = vpop.permute.xlu1 %535 }
  0x9e   : > { %1420 = vmatmul.mubr.msk.bf16.vlgmr.msra.gmra.mrb[4].mxu1 %vm200_vm3, %v171_v63  ;;  %v540_v12 = vsel %vm539_vm5, %v534_v0, %v536_v4 }
  0x9f   : > { %1424 = vmatpush3.bf16.msra.mxu1 %v427_v2  ;;  %1425 = vmatprep.mubr.msk.bf16.mxu1 %vm1594_vm0, %v1593_v3  ;;  %v538_v7 = vpop.permute.xlu0 %537  ;;  %v546_v15 = vsel %vm204_vm1, %v540_v12, 0 }
  0xa0   : > { %v541_v8 = vsel %vm539_vm5, %v536_v4, %v538_v7  ;;  %1429 = vmatprep.subr.bf16.mxu1 %v1593_v3  ;;  %v552_v13 = vsel %vm204_vm1, %v538_v7, 0 }
  0xa1   : > { %1360 = vmatmul.mubr.msk.bf16.vlgmr.msra.gmra.mrb[4].mxu0 %vm200_vm3, %v171_v63  ;;  %v659_v9 = vpop.permute.xlu1 %658 }
  0xa2   : > { %430 = vmatpush1.bf16.msra.mxu0 %v421_v5  ;;  %461 = vmatprep.mubr.bf16.mxu0 %v1595_v6 }
  0xa3   : > { %1367 = vmatprep.subr.msk.bf16.mxu0 %vm204_vm1, %v541_v8  ;;  %v661_v11 = vpop.permute.xlu0 %660 }
  0xa4   : > { %v665_v20 = vsel %vm664_vm6, %v659_v9, %v661_v11 }
  0xa5   : > { %v663_v14 = vpop.permute.xlu1 %662  ;;  %v671_v23 = vsel %vm204_vm1, %v665_v20, 0 }
  0xa6   : > { %1426 = vmatmul.mubr.msk.bf16.vlgmr.msra.gmra.mrb[8].mxu1 %vm200_vm3, %v1362_v10  ;;  %v666_v17 = vsel %vm664_vm6, %v661_v11, %v663_v14  ;;  %v677_v21 = vsel %vm204_vm1, %v663_v14, 0 }
  0xa7   : > { %1430 = vmatpush3.bf16.msra.mxu1 %v552_v13  ;;  %1431 = vmatprep.mubr.msk.bf16.mxu1 %vm1594_vm0, %v1593_v3  ;;  %v784_v16 = vpop.permute.xlu0 %783 }
  0xa8   : > { %1435 = vmatprep.subr.bf16.mxu1 %v1593_v3 }
  0xa9   : > { %1364 = vmatmul.mubr.msk.bf16.vlgmr.msra.gmra.mrb[8].mxu0 %vm200_vm3, %v1362_v10  ;;  %v786_v18 = vpop.permute.xlu1 %785 }
  0xaa   : > { %555 = vmatpush1.bf16.msra.mxu0 %v546_v15  ;;  %586 = vmatprep.mubr.bf16.mxu0 %v1595_v6  ;;  %v790_v28 = vsel %vm789_vm7, %v784_v16, %v786_v18 }
  0xab   : > { %1371 = vmatprep.subr.msk.bf16.mxu0 %vm204_vm1, %v666_v17  ;;  %v788_v22 = vpop.permute.xlu0 %787  ;;  %v796_v31 = vsel %vm204_vm1, %v790_v28, 0 }
  0xac   : > { %v791_v25 = vsel %vm789_vm7, %v786_v18, %v788_v22  ;;  %v802_v29 = vsel %vm204_vm1, %v788_v22, 0 }
  0xad   : > { %v909_v24 = vpop.permute.xlu1 %908 }
  0xae   : > { %1432 = vmatmul.mubr.msk.bf16.vlgmr.msra.gmra.mrb[12].mxu1 %vm200_vm3, %v1366_v19 }
  0xaf   : > { %1436 = vmatpush3.bf16.msra.mxu1 %v677_v21  ;;  %1437 = vmatprep.mubr.msk.bf16.mxu1 %vm1594_vm0, %v1593_v3  ;;  %v911_v26 = vpop.permute.xlu0 %910 }
  0xb0   : > { %1441 = vmatprep.subr.bf16.mxu1 %v1593_v3  ;;  %v915_v36 = vsel %vm914_vm8, %v909_v24, %v911_v26 }
  0xb1   : > { %1368 = vmatmul.mubr.msk.bf16.vlgmr.msra.gmra.mrb[12].mxu0 %vm200_vm3, %v1366_v19  ;;  %v913_v30 = vpop.permute.xlu1 %912  ;;  %v921_v39 = vsel %vm204_vm1, %v915_v36, 0 }
  0xb2   : > { %680 = vmatpush1.bf16.msra.mxu0 %v671_v23  ;;  %711 = vmatprep.mubr.bf16.mxu0 %v1595_v6  ;;  %v916_v33 = vsel %vm914_vm8, %v911_v26, %v913_v30  ;;  %v927_v37 = vsel %vm204_vm1, %v913_v30, 0 }
  0xb3   : > { %1375 = vmatprep.subr.msk.bf16.mxu0 %vm204_vm1, %v791_v25  ;;  %v1034_v32 = vpop.permute.xlu0 %1033 }
  0xb5   : > { %v1036_v34 = vpop.permute.xlu1 %1035 }
  0xb6   : > { %1438 = vmatmul.mubr.msk.bf16.vlgmr.msra.gmra.mrb[16].mxu1 %vm200_vm3, %v1370_v27  ;;  %v1040_v43 = vsel %vm1039_vm9, %v1034_v32, %v1036_v34 }
  0xb7   : > { %1442 = vmatpush3.bf16.msra.mxu1 %v802_v29  ;;  %1443 = vmatprep.mubr.msk.bf16.mxu1 %vm1594_vm0, %v1593_v3  ;;  %v1038_v38 = vpop.permute.xlu0 %1037  ;;  %v1046_v47 = vsel %vm204_vm1, %v1040_v43, 0 }
  0xb8   : > { %1447 = vmatprep.subr.bf16.mxu1 %v1593_v3  ;;  %v1041_v41 = vsel %vm1039_vm9, %v1036_v34, %v1038_v38  ;;  %v1052_v44 = vsel %vm204_vm1, %v1038_v38, 0 }
  0xb9   : > { %1372 = vmatmul.mubr.msk.bf16.vlgmr.msra.gmra.mrb[16].mxu0 %vm200_vm3, %v1370_v27  ;;  %v1159_v40 = vpop.permute.xlu1 %1158 }
  0xba   : > { %805 = vmatpush1.bf16.msra.mxu0 %v796_v31  ;;  %836 = vmatprep.mubr.bf16.mxu0 %v1595_v6 }
  0xbb   : > { %1379 = vmatprep.subr.msk.bf16.mxu0 %vm204_vm1, %v916_v33  ;;  %v1161_v45 = vpop.permute.xlu0 %1160 }
  0xbc   : > { %v1165_v50 = vsel %vm1164_vm10, %v1159_v40, %v1161_v45 }
  0xbd   : > { %v1163_v46 = vpop.permute.xlu1 %1162  ;;  %v1171_v52 = vsel %vm204_vm1, %v1165_v50, 0 }
  0xbe   : > { %1444 = vmatmul.mubr.msk.bf16.vlgmr.msra.gmra.mrb[20].mxu1 %vm200_vm3, %v1374_v35  ;;  %v1166_v48 = vsel %vm1164_vm10, %v1161_v45, %v1163_v46  ;;  %v1177_v51 = vsel %vm204_vm1, %v1163_v46, 0 }
  0xbf   : > { %1448 = vmatpush3.bf16.msra.mxu1 %v927_v37  ;;  %1449 = vmatprep.mubr.msk.bf16.mxu1 %vm1594_vm0, %v1593_v3 }
  0xc0   : > { %1453 = vmatprep.subr.bf16.mxu1 %v1593_v3 }
  0xc1   : > { %1376 = vmatmul.mubr.msk.bf16.vlgmr.msra.gmra.mrb[20].mxu0 %vm200_vm3, %v1374_v35 }
  0xc2   : > { %930 = vmatpush1.bf16.msra.mxu0 %v921_v39  ;;  %961 = vmatprep.mubr.bf16.mxu0 %v1595_v6 }
  0xc3   : > { %1383 = vmatprep.subr.msk.bf16.mxu0 %vm204_vm1, %v1041_v41 }
  0xc6   : > { %1450 = vmatmul.mubr.msk.bf16.vlgmr.msra.gmra.mrb[24].mxu1 %vm200_vm3, %v1378_v42 }
  0xc7   : > { %1454 = vmatpush3.bf16.msra.mxu1 %v1052_v44  ;;  %1455 = vmatprep.mubr.msk.bf16.mxu1 %vm1594_vm0, %v1593_v3 }
  0xc8   : > { %1459 = vmatprep.subr.bf16.mxu1 %v1593_v3 }
  0xc9   : > { %1380 = vmatmul.mubr.msk.bf16.vlgmr.msra.gmra.mrb[24].mxu0 %vm200_vm3, %v1378_v42 }
  0xca   : > { %1055 = vmatpush1.bf16.msra.mxu0 %v1046_v47  ;;  %1086 = vmatprep.mubr.bf16.mxu0 %v1595_v6 }
  0xcb   : > { %1387 = vmatprep.subr.msk.bf16.mxu0 %vm204_vm1, %v1166_v48 }
  0xce   : > { %1456 = vmatmul.mubr.msk.bf16.vlgmr.msra.gmra.mrb[28].mxu1 %vm200_vm3, %v1382_v49 }
  0xcf   : > { %1460 = vmatpush3.bf16.msra.mxu1 %v1177_v51  ;;  %1461 = vmatprep.mubr.msk.bf16.mxu1 %vm1594_vm0, %v1593_v3 }
  0xd1   : > { %1384 = vmatmul.mubr.msk.bf16.vlgmr.msra.gmra.mrb[28].mxu0 %vm200_vm3, %v1382_v49 }
  0xd2   : > { %1180 = vmatpush1.bf16.msra.mxu0 %v1171_v52  ;;  %1211 = vmatprep.mubr.bf16.mxu0 %v1595_v6 }
  0xd6   : > { %1462 = vmatmul.mubr.msk.bf16.vlgmr.msra.gmra.mrb[32].mxu1 %vm200_vm3, %v1386_v53 }
  0xd9   : > { %1388 = vmatmul.mubr.msk.bf16.vlgmr.msra.gmra.mrb[32].mxu0 %vm200_vm3, %v1386_v53 }
 0x169   : > { %v289_v54 = vpop.f32.mrb[0].mxu1 }
 0x16a   : > { %v1415_v55 = vpop.f32.mrb[1].mxu1 }
 0x16b   : > { %v292_v56 = vpop.f32.mrb[2].mxu1 }
 0x16c   : > { %v248_v57 = vpop.f32.mrb[0].mxu0  ;;  %v1416_v58 = vpop.f32.mrb[3].mxu1 }
 0x16d   : > { %v250_v59 = vpop.f32.mrb[1].mxu0 }
 0x16e   : > { %v252_v3 = vpop.f32.mrb[2].mxu0 }
 0x16f   : > { %v253_v60 = vpop.f32.mrb[3].mxu0 }
 0x171   : > { %v382_v61 = vpop.f32.mrb[4].mxu1 }
 0x172   : > { %v383_v62 = vadd.f32 %v382_v61, %v289_v54  ;;  %v1421_v63 = vpop.f32.mrb[5].mxu1 }
 0x173   : > { %v385_v6 = vpop.f32.mrb[6].mxu1 }
 0x174   : > { %v341_v0 = vpop.f32.mrb[4].mxu0  ;;  %v1422_v1 = vpop.f32.mrb[7].mxu1 }
 0x175   : > { %v342_v2 = vadd.f32 %v341_v0, %v248_v57  ;;  %v343_v4 = vpop.f32.mrb[5].mxu0 }
 0x176   : > { %v344_v5 = vadd.f32 %v343_v4, %v250_v59  ;;  %v345_v7 = vpop.f32.mrb[6].mxu0 }
 0x177   : > { %v346_v8 = vpop.f32.mrb[7].mxu0 }
 0x179   : > { %v504_v9 = vpop.f32.mrb[8].mxu1 }
 0x17a   : > { %v512_v10 = vadd.f32 %v504_v9, %v383_v62  ;;  %v1427_v11 = vpop.f32.mrb[9].mxu1 }
 0x17b   : > { %v507_v12 = vpop.f32.mrb[10].mxu1 }
 0x17c   : > { %v463_v13 = vpop.f32.mrb[8].mxu0  ;;  %v1428_v14 = vpop.f32.mrb[11].mxu1 }
 0x17d   : > { %v510_v15 = vadd.f32 %v463_v13, %v342_v2  ;;  %v465_v16 = vpop.f32.mrb[9].mxu0  ;;  %v1267_v12 = vpop.permute.xlu0 %1266 }
 0x17e   : > { %v511_v17 = vadd.f32 %v465_v16, %v344_v5  ;;  %v467_v18 = vpop.f32.mrb[10].mxu0 }
 0x17f   : > { %v468_v19 = vpop.f32.mrb[11].mxu0 }
 0x181   : > { %v629_v20 = vpop.f32.mrb[12].mxu1 }
 0x182   : > { %v637_v21 = vadd.f32 %v629_v20, %v512_v10  ;;  %v1433_v22 = vpop.f32.mrb[13].mxu1 }
 0x183   : > { %v632_v23 = vpop.f32.mrb[14].mxu1 }
 0x184   : > { %v588_v24 = vpop.f32.mrb[12].mxu0  ;;  %v1434_v25 = vpop.f32.mrb[15].mxu1 }
 0x185   : > { %v635_v26 = vadd.f32 %v588_v24, %v510_v15  ;;  %v590_v27 = vpop.f32.mrb[13].mxu0 }
 0x186   : > { %v636_v28 = vadd.f32 %v590_v27, %v511_v17  ;;  %v592_v29 = vpop.f32.mrb[14].mxu0 }
 0x187   : > { %v593_v30 = vpop.f32.mrb[15].mxu0 }
 0x189   : > { %v754_v31 = vpop.f32.mrb[16].mxu1 }
 0x18a   : > { %v762_v32 = vadd.f32 %v754_v31, %v637_v21  ;;  %v1439_v33 = vpop.f32.mrb[17].mxu1 }
 0x18b   : > { %v757_v34 = vpop.f32.mrb[18].mxu1 }
 0x18c   : > { %v713_v35 = vpop.f32.mrb[16].mxu0  ;;  %v1440_v36 = vpop.f32.mrb[19].mxu1 }
 0x18d   : > { %v760_v37 = vadd.f32 %v713_v35, %v635_v26  ;;  %v715_v38 = vpop.f32.mrb[17].mxu0 }
 0x18e   : > { %v761_v39 = vadd.f32 %v715_v38, %v636_v28  ;;  %v717_v40 = vpop.f32.mrb[18].mxu0 }
 0x18f   : > { %v718_v41 = vpop.f32.mrb[19].mxu0 }
 0x191   : > { %v879_v42 = vpop.f32.mrb[20].mxu1 }
 0x192   : > { %v887_v43 = vadd.f32 %v879_v42, %v762_v32  ;;  %v1445_v44 = vpop.f32.mrb[21].mxu1 }
 0x193   : > { %v882_v45 = vpop.f32.mrb[22].mxu1 }
 0x194   : > { %v838_v46 = vpop.f32.mrb[20].mxu0  ;;  %v1446_v47 = vpop.f32.mrb[23].mxu1 }
 0x195   : > { %v885_v48 = vadd.f32 %v838_v46, %v760_v37  ;;  %v840_v49 = vpop.f32.mrb[21].mxu0 }
 0x196   : > { %v886_v50 = vadd.f32 %v840_v49, %v761_v39  ;;  %v842_v51 = vpop.f32.mrb[22].mxu0 }
 0x197   : > { %v843_v52 = vpop.f32.mrb[23].mxu0 }
 0x199   : > { %v1004_v53 = vpop.f32.mrb[24].mxu1 }
 0x19a   : > { %v1012_v54 = vadd.f32 %v1004_v53, %v887_v43  ;;  %v1451_v55 = vpop.f32.mrb[25].mxu1 }
 0x19b   : > { %v1007_v56 = vpop.f32.mrb[26].mxu1 }
 0x19c   : > { %v963_v57 = vpop.f32.mrb[24].mxu0  ;;  %v1452_v58 = vpop.f32.mrb[27].mxu1 }
 0x19d   : > { %v1010_v59 = vadd.f32 %v963_v57, %v885_v48  ;;  %v965_v3 = vpop.f32.mrb[25].mxu0 }
 0x19e   : > { %v1011_v60 = vadd.f32 %v965_v3, %v886_v50  ;;  %v967_v61 = vpop.f32.mrb[26].mxu0 }
 0x19f   : > { %v968_v62 = vpop.f32.mrb[27].mxu0 }
 0x1a1   : > { %v1129_v63 = vpop.f32.mrb[28].mxu1 }
 0x1a2   : > { %v1137_v6 = vadd.f32 %v1129_v63, %v1012_v54  ;;  %v1457_v0 = vpop.f32.mrb[29].mxu1 }
 0x1a3   : > { %v1132_v1 = vpop.f32.mrb[30].mxu1 }
 0x1a4   : > { %v1088_v2 = vpop.f32.mrb[28].mxu0  ;;  %v1458_v4 = vpop.f32.mrb[31].mxu1 }
 0x1a5   : > { %v1135_v5 = vadd.f32 %v1088_v2, %v1010_v59  ;;  %v1090_v7 = vpop.f32.mrb[29].mxu0 }
 0x1a6   : > { %v1136_v8 = vadd.f32 %v1090_v7, %v1011_v60  ;;  %v1092_v9 = vpop.f32.mrb[30].mxu0 }
 0x1a7   : > { %v1093_v10 = vpop.f32.mrb[31].mxu0 }
 0x1a9   : > { %v1254_v11 = vpop.f32.mrb[32].mxu1 }
 0x1aa   : > { %v1262_v13 = vadd.f32 %v1254_v11, %v1137_v6  ;;  %v1463_v14 = vpop.f32.mrb[33].mxu1 }
 0x1ab   : > { %v1257_v15 = vpop.f32.mrb[34].mxu1 }
 0x1ac   : > { %v1271_v16 = vadd.f32 %v1267_v12, %v1262_v13  ;;  %v1213_v17 = vpop.f32.mrb[32].mxu0  ;;  %v1464_v18 = vpop.f32.mrb[35].mxu1 }
 0x1ad   : > { %v1260_v19 = vadd.f32 %v1213_v17, %v1135_v5  ;;  %v1215_v20 = vpop.f32.mrb[33].mxu0 }
 0x1ae   : > { %1275 = vst.msk [vmem:[%s163_s24 + $0x10] sm:$0xff] %vm1274_vm11, %v1271_v16  ;;  %v1261_v21 = vadd.f32 %v1215_v20, %v1136_v8  ;;  %v1217_v22 = vpop.f32.mrb[34].mxu0 }
 0x1af   : > { %v1269_v23 = vadd.f32 %v1267_v12, %v1260_v19  ;;  %v1218_v24 = vpop.f32.mrb[35].mxu0 }
 0x1b0   : > { %v1270_v25 = vadd.f32 %v1267_v12, %v1261_v21 }
 0x1b1   : > { %1272 = vst [vmem:[%s163_s24] sm:$0xff] %v1269_v23 }
 0x1b2   : > { %1273 = vst [vmem:[%s163_s24 + $0x8] sm:$0xff] %v1270_v25 }
 0x1b3   : > { %1541 = shalt.err (!%p1538_p3)
}
 0x1b4   : > { %s1542_s6 = scalar_lea.hbm %s1841_s28, 384  ;;  %s1546_s9 = scalar_lea.hbm %s1888_s3, 768 }
 0x1b5   : > { %p1543_p4 = scmp.ne.s32.totalorder %s1841_s28, %s1542_s6  ;;  %p1547_p9 = scmp.lt.u32.totalorder %s1841_s28, %s1888_s3 }
 0x1b6   : > { %p1548_p10 = scmp.lt.u32.totalorder %s1546_s9, %s1542_s6  ;;  %p1550_p12 = scmp.lt.u32.totalorder %s1542_s6, %s1841_s28 }
 0x1b7   : > { %p1544_p7 = pnand %p1543_p4, %p1663_p5 }
 0x1b8   : > { %p1549_p11 = por %p1548_p10, %p1547_p9 }
 0x1b9   : > { %p1545_p8 = pneg %p1544_p7 }
 0x1ba   : > { %p1551_p13 = por %p1550_p12, %p1549_p11 }
 0x1bc   : > { %p1552_p0 = pnand %p1551_p13, %p1545_p8 }
 0x1be   : > { %1555 = shalt.err (!%p1552_p0)
}
 0x1bf   : > { %1468 = dma.vmem_to_hbm [thread:$0]  (%p1663_p5), %s1843_s25, 384, %s1841_s28, %s1277_s16  }
 0x1c0 PF: > { %p1474_p1 = scmp.ge.s32.totalorder %s1590_s15, 2  ;;  %s1303_s17 = sand.u32 1, %s1578_s12  }
 0x1c1   : > { %s1304_s19 = scalar_lea.sflag [#allocation3], %s1303_s17 }
 0x1c2   : > { %p1471_p2 = pnand %p1474_p1, %p1667_p6 }
 0x1c4   : > { %1573 = dma.done.wait (!%p1471_p2), %s1304_s19, 384  }
 0x1c5   : > { %1575 = vsyncadd (!%p1471_p2), %s1304_s19, 4294966912  ;;  %p13_p3 = scmp.ge.s32.totalorder %s1650_s18, 4   ;;  %s1891_s12 = smov %s1582_s13 }
 0x1c6   : > { %s1892_s13 = smov %s1586_s14  ;;  %s1893_s14 = smov %s1661_s21 }
 0x1c7   : > { %s1894_s15 = smov %s1650_s18  ;;  %15 = sbr.rel (!%p13_p3) target bundleno = 3 (0x3), region = 75 }
 0x1ce   :  { %1309 = vsyncpa [#allocation3], 1 }
 0x1cf   :  { %1311 = vsyncpa [#allocation3 + $0x1], 1 }

</bundles_post_ra>
